<compile_context>
chip_gen: v7x
topology: tpu7x:2x2x1
jax: 0.10.0
libtpu: 0.0.40
codegen_flags: <defaults>
</compile_context>

<pallas_src>
import math
import functools
from typing import Any, NamedTuple

import jax
import jax.numpy as jnp
from jax.experimental import pallas as pl
from jax.experimental.pallas import tpu as pltpu


def _round_up(a, b):
    return (a + b - 1) // b * b


def _cdiv(a, b):
    return -(-a // b)


def _tpu_vmem_and_cores():
    """(per-TensorCore VMEM bytes, TensorCores per chip) with safe fallbacks."""
    vmem = 128 * 1024 * 1024
    cores = 0
    try:
        info = pltpu.get_tpu_info()
        vmem = int(getattr(info, "vmem_capacity_bytes", vmem) or vmem)
        cores = int(getattr(info, "num_cores",
                            getattr(info, "tensorcores_per_chip", 0)) or 0)
    except Exception:
        pass
    if cores <= 0:
        # v7x-class parts have 64 MiB/TC and 2 TCs/chip; infer the core count
        # from the halved VMEM when the info object does not expose it.
        cores = 2 if vmem <= 96 * 1024 * 1024 else 1
    return vmem, cores


class ArcfacePlan(NamedTuple):
    num_classes: int
    embedding_size: int
    batch: int
    stream_dtype: Any       # dtype the weight is streamed from HBM in
    compute_dtype: Any      # dtype fed to the MXU (f32 or bf16)
    out_dtype: Any
    tile_classes: int
    tile_batch: int
    c_pad: int
    b_pad: int
    vmem_limit_bytes: int


def plan_arcface(num_classes, embedding_size, batch, *,
                 stream_dtype=jnp.float32, out_dtype=jnp.float32,
                 tile_classes=None, tile_batch=None,
                 vmem_budget_bytes=None, vmem_limit_bytes=None):
    """Pick generation-aware tile sizes / VMEM limits.  Call once per model."""
    vmem_cap, cores = _tpu_vmem_and_cores()
    if vmem_budget_bytes is None:
        # ~48 MiB on 128 MiB parts (v5e/v6e), ~24 MiB on v7x's 64 MiB/TC.
        vmem_budget_bytes = int(vmem_cap * 0.375)
    if vmem_limit_bytes is None:
        vmem_limit_bytes = int(vmem_cap * 0.80)
    vmem_limit_bytes = max(32 * 1024 * 1024,
                           min(vmem_limit_bytes, vmem_cap - 8 * 1024 * 1024))

    stream_dtype = jnp.dtype(stream_dtype)
    compute_dtype = (jnp.dtype(jnp.float32)
                     if stream_dtype == jnp.dtype(jnp.float32)
                     else jnp.dtype(jnp.bfloat16))
    out_dtype = jnp.dtype(out_dtype)
    w_isz = stream_dtype.itemsize
    x_isz = compute_dtype.itemsize
    o_isz = out_dtype.itemsize

    E = embedding_size
    b_pad = _round_up(batch, 8)
    if tile_batch is None:
        tb = b_pad if b_pad <= 512 else 256
    else:
        tb = min(_round_up(int(tile_batch), 8), b_pad)
    b_pad = _round_up(b_pad, tb)

    c128 = _round_up(num_classes, 128)
    if tile_classes is None:
        # Per-step working set: double-buffered weight + inv_norm tiles,
        # resident x/label, double-buffered output, f32 margin temporaries.
        fixed = 2 * tb * E * x_isz + 2 * tb * 4
        per_class = 2 * E * w_isz + 8 + 2 * tb * o_isz + 6 * tb * 4
        tc_max = max(128, ((vmem_budget_bytes - fixed) // per_class) // 128 * 128)
    else:
        tc_max = max(128, _round_up(int(tile_classes), 128))
    tc_max = min(tc_max, c128)
    n_tiles = _cdiv(c128, tc_max)
    # Even class-tile count on 2-TensorCore chips so megacore sharding is
    # balanced; single-TC chips keep the minimal tile count (less overhead).
    if cores >= 2 and c128 >= 256 and n_tiles % 2 == 1:
        n_tiles += 1
    tc = _round_up(_cdiv(c128, n_tiles), 128)
    c_pad = _round_up(c128, tc)

    return ArcfacePlan(num_classes=num_classes, embedding_size=E, batch=batch,
                       stream_dtype=stream_dtype, compute_dtype=compute_dtype,
                       out_dtype=out_dtype, tile_classes=tc, tile_batch=tb,
                       c_pad=c_pad, b_pad=b_pad,
                       vmem_limit_bytes=int(vmem_limit_bytes))


def prepare_arcface_weight(weight, plan):
    """One-time weight prep (NOT per forward call): cast to the streaming
    dtype, compute per-class inverse L2 norms, pad classes to the tile
    multiple.  Returns (w_stream (c_pad, E), inv_norm (1, c_pad) f32)."""
    C, E = weight.shape
    assert C == plan.num_classes and E == plan.embedding_size
    w32 = weight.astype(jnp.float32)
    sd = jnp.dtype(plan.stream_dtype)
    if sd == jnp.dtype(jnp.int8):
        # Per-class symmetric int8.  The per-class scale cancels inside
        # F.normalize, so only the integer values (and their norms) are kept.
        absmax = jnp.max(jnp.abs(w32), axis=1, keepdims=True)
        scale = jnp.where(absmax > 0, absmax / 127.0, 1.0)
        q = jnp.clip(jnp.round(w32 / scale), -127.0, 127.0)
        w_stream = q.astype(jnp.int8)
        w_for_norm = q
    else:
        w_stream = w32.astype(sd)
        w_for_norm = w_stream.astype(jnp.float32)
    sumsq = jnp.sum(w_for_norm * w_for_norm, axis=1)
    inv_norm = jax.lax.rsqrt(jnp.maximum(sumsq, 1e-24)).astype(jnp.float32)

    if plan.c_pad != C:
        w_stream = jnp.pad(w_stream, ((0, plan.c_pad - C), (0, 0)))
        inv_norm = jnp.pad(inv_norm, (0, plan.c_pad - C))
    return w_stream, inv_norm.reshape(1, plan.c_pad)


def _arcface_kernel(x_ref, w_ref, invn_ref, label_ref, o_ref, *,
                    s, cos_m, sin_m, th, mm, tile_classes, matmul_precision):
    j = pl.program_id(0)                      # class-tile index

    x = x_ref[...]                            # (TB, E)  compute dtype
    w = w_ref[...]                            # (TC, E)  stream dtype
    inv_norm = invn_ref[...]                  # (1, TC)  f32, precomputed
    label = label_ref[...]                    # (TB, 1)  int32

    if w.dtype != x.dtype:
        # Dequantize / widen the streamed weight tile for the MXU (VPU work
        # that hides under the weight DMA).  Integer dtypes go through f32.
        if jnp.issubdtype(w.dtype, jnp.integer):
            w = w.astype(jnp.float32)
        w = w.astype(x.dtype)

    # cosine = x @ normalize(w).T as an NT contraction; the precomputed
    # per-class 1/||w|| is a lane-oriented column scale on the result.
    raw = jax.lax.dot_general(
        x, w,
        dimension_numbers=(((1,), (1,)), ((), ())),
        preferred_element_type=jnp.float32,
        precision=matmul_precision)           # (TB, TC) f32
    cosine = raw * inv_norm

    # ArcFace margin, all f32 on the small (TB, TC) tile.
    # (At very large B one could restrict phi to the label column only.)
    sine = jnp.sqrt(jnp.clip(1.0 - cosine * cosine, 0.0, 1.0))
    phi = cosine * cos_m - sine * sin_m
    phi = jnp.where(cosine > th, phi, cosine - mm)

    # one_hot(label) restricted to this class tile (global column index).
    col = jax.lax.broadcasted_iota(jnp.int32, cosine.shape, 1) + j * tile_classes
    one_hot = label == col

    o_ref[...] = (jnp.where(one_hot, phi, cosine) * s).astype(o_ref.dtype)


def arcface_head_apply(x, label, w_stream, inv_norm, plan, *, s=64.0, m=0.5,
                       matmul_precision=None):
    """Forward pass with a pre-prepared weight (the fast path).

    matmul_precision: pass jax.lax.Precision.HIGHEST for exact-f32 parity with
    the PyTorch module when streaming f32 weights (the extra MXU passes stay
    hidden while the kernel is HBM-bound).  Default matches XLA's default
    (bf16-rounded matmul inputs, f32 accumulation)."""
    B, E = x.shape
    assert E == plan.embedding_size
    assert w_stream.shape == (plan.c_pad, E)
    assert inv_norm.shape == (1, plan.c_pad)

    x = x.astype(plan.compute_dtype)
    label2d = label.astype(jnp.int32).reshape(-1, 1)
    if plan.b_pad != B:
        x = jnp.pad(x, ((0, plan.b_pad - B), (0, 0)))
        label2d = jnp.pad(label2d, ((0, plan.b_pad - B), (0, 0)))

    cos_m, sin_m = math.cos(m), math.sin(m)
    th, mm = math.cos(math.pi - m), math.sin(math.pi - m) * m

    tc, tb = plan.tile_classes, plan.tile_batch
    kernel = functools.partial(
        _arcface_kernel, s=float(s), cos_m=cos_m, sin_m=sin_m, th=th, mm=mm,
        tile_classes=tc, matmul_precision=matmul_precision)

    grid = (plan.c_pad // tc, plan.b_pad // tb)   # batch is the inner axis ->
    out = pl.pallas_call(                         # weight tile stays resident.
        kernel,
        out_shape=jax.ShapeDtypeStruct((plan.b_pad, plan.c_pad), plan.out_dtype),
        grid_spec=pltpu.PrefetchScalarGridSpec(
            num_scalar_prefetch=0,
            grid=grid,
            in_specs=[
                pl.BlockSpec((tb, E), lambda j, i: (i, 0)),      # x
                pl.BlockSpec((tc, E), lambda j, i: (j, 0)),      # weight tile
                pl.BlockSpec((1, tc), lambda j, i: (0, j)),      # 1/||w|| tile
                pl.BlockSpec((tb, 1), lambda j, i: (i, 0)),      # labels
            ],
            out_specs=pl.BlockSpec((tb, tc), lambda j, i: (i, j)),
        ),
        compiler_params=pltpu.CompilerParams(
            dimension_semantics=("parallel", "parallel"),
            vmem_limit_bytes=plan.vmem_limit_bytes,
        ),
    )(x, w_stream, inv_norm, label2d)

    if plan.b_pad != B or plan.c_pad != plan.num_classes:
        out = out[:B, :plan.num_classes]
    return out


def arcface_head(x, weight, label, *, s=64.0, m=0.5, stream_dtype=None,
                 out_dtype=jnp.float32, tile_classes=None, tile_batch=None,
                 matmul_precision=None):
    """Convenience one-shot path (plans + preps the weight on EVERY call).
    For real use, call plan_arcface / prepare_arcface_weight once per model
    and reuse arcface_head_apply."""
    B, E = x.shape
    C, E2 = weight.shape
    assert E == E2
    sd = weight.dtype if stream_dtype is None else stream_dtype
    plan = plan_arcface(C, E, B, stream_dtype=sd, out_dtype=out_dtype,
                        tile_classes=tile_classes, tile_batch=tile_batch)
    w_stream, inv_norm = prepare_arcface_weight(weight, plan)
    return arcface_head_apply(x, label, w_stream, inv_norm, plan, s=s, m=m,
                              matmul_precision=matmul_precision)


def _reference(x, weight, label, *, s=64.0, m=0.5, precision=None):
    """Pure-JAX reference for Arcface_Head.forward (same matmul precision as
    the kernel so the comparison is not dominated by bf16 input rounding)."""
    cos_m, sin_m = math.cos(m), math.sin(m)
    th, mm = math.cos(math.pi - m), math.sin(math.pi - m) * m
    w32 = weight.astype(jnp.float32)
    inv = 1.0 / jnp.maximum(jnp.linalg.norm(w32, axis=1, keepdims=True), 1e-12)
    cosine = jnp.dot(x.astype(jnp.float32), w32.T, precision=precision) * inv.T
    sine = jnp.sqrt(jnp.clip(1.0 - cosine * cosine, 0.0, 1.0))
    phi = cosine * cos_m - sine * sin_m
    phi = jnp.where(cosine > th, phi, cosine - mm)
    one_hot = jax.nn.one_hot(label, weight.shape[0], dtype=jnp.float32)
    return (one_hot * phi + (1.0 - one_hot) * cosine) * s


if __name__ == "__main__":
    # Small shapes consistent with the module (embedding_size=128 default).
    # num_classes deliberately NOT a multiple of 128 to exercise padding.
    B, E, C = 8, 128, 1000
    s_val, m_val = 64.0, 0.5

    key = jax.random.PRNGKey(0)
    kx, kw, kl = jax.random.split(key, 3)

    x = jax.random.normal(kx, (B, E), dtype=jnp.float32)
    bound = math.sqrt(6.0 / (E + C))          # xavier_uniform_ on (C, E)
    weight = jax.random.uniform(kw, (C, E), minval=-bound, maxval=bound,
                                dtype=jnp.float32)
    label = jax.random.randint(kl, (B,), 0, C, dtype=jnp.int32)

    # --- f32 weight stream (module semantics); weight prepared ONCE. --------
    plan32 = plan_arcface(C, E, B, stream_dtype=jnp.float32)
    w32, invn32 = prepare_arcface_weight(weight, plan32)
    out = jax.block_until_ready(
        arcface_head_apply(x, label, w32, invn32, plan32, s=s_val, m=m_val))
    ref = _reference(x, weight, label, s=s_val, m=m_val)
    assert out.shape == (B, C)
    assert jnp.allclose(out, ref, rtol=2e-2, atol=2e-2), "f32 mismatch"

    # --- bf16 weight stream (2x less HBM traffic, f32 accumulation). --------
    plan_bf = plan_arcface(C, E, B, stream_dtype=jnp.bfloat16)
    wbf, invnbf = prepare_arcface_weight(weight, plan_bf)
    out_bf = jax.block_until_ready(
        arcface_head_apply(x, label, wbf, invnbf, plan_bf, s=s_val, m=m_val))
    xq = x.astype(jnp.bfloat16).astype(jnp.float32)
    wq = weight.astype(jnp.bfloat16).astype(jnp.float32)
    ref_bf = _reference(xq, wq, label, s=s_val, m=m_val)
    assert out_bf.shape == (B, C)
    assert jnp.allclose(out_bf, ref_bf, rtol=2e-2, atol=5e-2), "bf16 mismatch"

    # --- int8 weight stream (4x less HBM; scale-free thanks to normalize). --
    plan_i8 = plan_arcface(C, E, B, stream_dtype=jnp.int8)
    wi8, invni8 = prepare_arcface_weight(weight, plan_i8)
    out_i8 = jax.block_until_ready(
        arcface_head_apply(x, label, wi8, invni8, plan_i8, s=s_val, m=m_val))
    absmax = jnp.max(jnp.abs(weight), axis=1, keepdims=True)
    qf = jnp.clip(jnp.round(weight * (127.0 / jnp.maximum(absmax, 1e-12))),
                  -127.0, 127.0)
    ref_i8 = _reference(xq, qf, label, s=s_val, m=m_val)
    assert out_i8.shape == (B, C)
    assert jnp.allclose(out_i8, ref_i8, rtol=2e-2, atol=1e-1), "int8 mismatch"

    # --- one-shot convenience wrapper (plans + preps per call). -------------
    out2 = jax.block_until_ready(arcface_head(x, weight, label, s=s_val, m=m_val))
    assert jnp.allclose(out2, ref, rtol=2e-2, atol=2e-2), "wrapper mismatch"

    print("KERNEL_OK")
</pallas_src>

<mosaic_0001>
module attributes {stable_mosaic.version = 11 : i64} {
  func.func @_arcface_kernel(%arg0: i32, %arg1: i32, %arg2: memref<8x128xf32, #tpu.memory_space<vmem>>, %arg3: memref<1024x128xf32, #tpu.memory_space<vmem>>, %arg4: memref<1x1024xf32, #tpu.memory_space<vmem>>, %arg5: memref<8x1xi32, #tpu.memory_space<vmem>>, %arg6: memref<8x1024xf32, #tpu.memory_space<vmem>>) attributes {dimension_semantics = [#tpu.dimension_semantics<parallel>, #tpu.dimension_semantics<parallel>], iteration_bounds = array<i64: 1, 1>, scalar_prefetch = 0 : i64, scratch_operands = 0 : i64, tpu.core_type = #tpu.core_type<tc>, window_params = [{transform_indices = @transform_0, window_bounds = array<i64: 8, 128>}, {transform_indices = @transform_1, window_bounds = array<i64: 1024, 128>}, {transform_indices = @transform_2, window_bounds = array<i64: 1, 1024>}, {transform_indices = @transform_3, window_bounds = array<i64: 8, 1>}, {transform_indices = @transform_4, window_bounds = array<i64: 8, 1024>}]} {
    %c0 = arith.constant 0 : index
    %c0_0 = arith.constant 0 : index
    %0 = vector.load %arg2[%c0, %c0_0] : memref<8x128xf32, #tpu.memory_space<vmem>>, vector<8x128xf32>
    %c0_1 = arith.constant 0 : index
    %c0_2 = arith.constant 0 : index
    %1 = vector.load %arg3[%c0_1, %c0_2] : memref<1024x128xf32, #tpu.memory_space<vmem>>, vector<1024x128xf32>
    %c0_3 = arith.constant 0 : index
    %c0_4 = arith.constant 0 : index
    %2 = vector.load %arg4[%c0_3, %c0_4] : memref<1x1024xf32, #tpu.memory_space<vmem>>, vector<1x1024xf32>
    %c0_5 = arith.constant 0 : index
    %c0_6 = arith.constant 0 : index
    %3 = vector.load %arg5[%c0_5, %c0_6] : memref<8x1xi32, #tpu.memory_space<vmem>>, vector<8x1xi32>
    %cst = arith.constant dense<0.000000e+00> : vector<8x1024xf32>
    %4 = tpu.matmul %0, %1, %cst {dimension_numbers = #tpu.dot_dimension_numbers<[1], [1], [0], [0], [0, 0, 1, 0], [], []>} : vector<8x128xf32>, vector<1024x128xf32>, vector<8x1024xf32> -> vector<8x1024xf32>
    %5 = vector.broadcast %2 : vector<1x1024xf32> to vector<8x1024xf32>
    %6 = arith.mulf %4, %5 : vector<8x1024xf32>
    %7 = arith.mulf %6, %6 : vector<8x1024xf32>
    %cst_7 = arith.constant 1.000000e+00 : f32
    %8 = vector.broadcast %cst_7 : f32 to vector<8x1024xf32>
    %9 = arith.subf %8, %7 : vector<8x1024xf32>
    %cst_8 = arith.constant 0.000000e+00 : f32
    %cst_9 = arith.constant 1.000000e+00 : f32
    %10 = vector.broadcast %cst_8 : f32 to vector<8x1024xf32>
    %11 = arith.maximumf %10, %9 : vector<8x1024xf32>
    %12 = vector.broadcast %cst_9 : f32 to vector<8x1024xf32>
    %13 = arith.minimumf %12, %11 : vector<8x1024xf32>
    %14 = math.sqrt %13 : vector<8x1024xf32>
    %cst_10 = arith.constant 0.87758255 : f32
    %15 = vector.broadcast %cst_10 : f32 to vector<8x1024xf32>
    %16 = arith.mulf %6, %15 : vector<8x1024xf32>
    %cst_11 = arith.constant 0.47942555 : f32
    %17 = vector.broadcast %cst_11 : f32 to vector<8x1024xf32>
    %18 = arith.mulf %14, %17 : vector<8x1024xf32>
    %19 = arith.subf %16, %18 : vector<8x1024xf32>
    %cst_12 = arith.constant -0.87758255 : f32
    %20 = vector.broadcast %cst_12 : f32 to vector<8x1024xf32>
    %21 = arith.cmpf ogt, %6, %20 : vector<8x1024xf32>
    %cst_13 = arith.constant 0.239712775 : f32
    %22 = vector.broadcast %cst_13 : f32 to vector<8x1024xf32>
    %23 = arith.subf %6, %22 : vector<8x1024xf32>
    %24 = arith.select %21, %19, %23 : vector<8x1024xi1>, vector<8x1024xf32>
    %25 = tpu.iota {dimensions = array<i32: 1>} : vector<8x1024xi32>
    %c1024_i32 = arith.constant 1024 : i32
    %26 = arith.muli %arg0, %c1024_i32 : i32
    %27 = vector.broadcast %26 : i32 to vector<8x1024xi32>
    %28 = arith.addi %25, %27 : vector<8x1024xi32>
    %29 = vector.broadcast %3 : vector<8x1xi32> to vector<8x1024xi32>
    %30 = arith.cmpi eq, %29, %28 : vector<8x1024xi32>
    %31 = arith.select %30, %24, %6 : vector<8x1024xi1>, vector<8x1024xf32>
    %cst_14 = arith.constant 6.400000e+01 : f32
    %32 = vector.broadcast %cst_14 : f32 to vector<8x1024xf32>
    %33 = arith.mulf %31, %32 : vector<8x1024xf32>
    %c0_15 = arith.constant 0 : index
    %c0_16 = arith.constant 0 : index
    %34 = vector.load %arg6[%c0_15, %c0_16] : memref<8x1024xf32, #tpu.memory_space<vmem>>, vector<8x1024xf32>
    tpu.vector_store %arg6[%c0_15, %c0_16], %33 {strides = array<i32>} : memref<8x1024xf32, #tpu.memory_space<vmem>>, vector<8x1024xf32>,
    return
  }
  func.func @transform_0(%arg0: i32, %arg1: i32) -> (i32, i32) {
    %c0_i32 = arith.constant 0 : i32
    %c0_i32_0 = arith.constant 0 : i32
    return %arg1, %c0_i32 : i32, i32
  }
  func.func @transform_1(%arg0: i32, %arg1: i32) -> (i32, i32) {
    %c0_i32 = arith.constant 0 : i32
    %c0_i32_0 = arith.constant 0 : i32
    return %arg0, %c0_i32 : i32, i32
  }
  func.func @transform_2(%arg0: i32, %arg1: i32) -> (i32, i32) {
    %c0_i32 = arith.constant 0 : i32
    %c0_i32_0 = arith.constant 0 : i32
    return %c0_i32, %arg0 : i32, i32
  }
  func.func @transform_3(%arg0: i32, %arg1: i32) -> (i32, i32) {
    %c0_i32 = arith.constant 0 : i32
    %c0_i32_0 = arith.constant 0 : i32
    return %arg1, %c0_i32 : i32, i32
  }
  func.func @transform_4(%arg0: i32, %arg1: i32) -> (i32, i32) {
    %c0_i32 = arith.constant 0 : i32
    return %arg1, %arg0 : i32, i32
  }
}

</mosaic_0001>

<bundles_post_ra>
// kernel: tpu_custom_call.1
= control target key start
LH: loop header
LB: loop body
LE: loop exit
PB: predicated region body
PF: predicated region fallthrough
CT: control target
= control target key end

     0   :  { %9 = vsyncpa [#allocation3], 0  ;;  %s1395_s0 = inlined_call_operand.hbm [shape: f32[8,128], index: 0, kind: input, shape index: {}]   ;;  %s1396_s1 = inlined_call_operand.hbm [shape: f32[1024,128], index: 1, kind: input, shape index: {}]   ;;  %s1397_s2 = inlined_call_operand.hbm [shape: f32[1,1024], index: 2, kind: input, shape index: {}]   ;;  %s1398_s3 = inlined_call_operand.hbm [shape: s32[8,1], index: 3, kind: input, shape index: {}]   ;;  %s1399_s4 = inlined_call_operand.hbm [shape: f32[8,1024], index: 4, kind: output, shape index: {}]  }
   0x1   :  { %10 = vsyncpa [#allocation6], 0 }
   0x2   :  { %11 = vsyncpa [#allocation9], 0 }
   0x3   :  { %12 = vsyncpa [#allocation4], 0  ;;  %s1153_s15 = smov [#allocation5]   ;;  %s1035_s19 = scalar_lea.hbm %s1396_s1, 16384 }
   0x4   :  { %s28_s16 = sshll.u32 %s1153_s15, 4  ;;  %p1036_p0 = scmp.ne.s32.totalorder %s1396_s1, %s1035_s19  ;;  %s29_s16 = int_to_ptr.vmem [resolvable:$true] %s28_s16 }
   0x5   :  { %p1039_p1 = scmp.lt.u32.totalorder %s1035_s19, %s1396_s1 }
   0x7   :  { %p1041_p2 = pnand %p1039_p1, %p1036_p0 }
   0x9   :  { %1044 = shalt.err (!%p1041_p2)
}
   0xa   :  { %s1045_s24 = scalar_lea.vmem %s29_s16, 16384  ;;  %p1050_p4 = scmp.lt.s32.totalorder %s29_s16, %s29_s16 }
   0xb   :  { %p1046_p3 = scmp.ne.s32.totalorder %s29_s16, %s1045_s24  ;;  %p1051_p5 = scmp.lt.s32.totalorder %s1045_s24, %s1045_s24 }
   0xd   :  { %p1052_p6 = por %p1051_p5, %p1050_p4 }
   0xf   :  { %p1053_p7 = pnand %p1052_p6, %p1046_p3 }
  0x11   :  { %1056 = shalt.err (!%p1053_p7)
}
  0x12   :  { %s1154_s25 = smov 128   ;;  %s1155_s26 = smov 8  }
  0x13   :  { %34 = dma.hbm_to_vmem [thread:$0]  %s1396_s1, 16384, %s29_s16, [#allocation6], %s1154_s25, %s1154_s25, %s1155_s26  }
  0x14   :  { %s1156_s29 = smov [#allocation2]   ;;  %s1157_s5 = smov [#allocation7]  }
  0x15   :  { %s19_s30 = sshll.u32 %s1156_s29, 4  ;;  %s41_s6 = sshll.u32 %s1157_s5, 4  ;;  %s20_s30 = int_to_ptr.vmem [resolvable:$true] %s19_s30  ;;  %s42_s6 = int_to_ptr.vmem [resolvable:$true] %s41_s6 }
  0x16   :  { %s1057_s9 = scalar_lea.hbm %s1395_s0, 128 }
  0x17   :  { %p1058_p8 = scmp.ne.s32.totalorder %s1395_s0, %s1057_s9  ;;  %p1061_p9 = scmp.lt.u32.totalorder %s1057_s9, %s1395_s0 }
  0x19   :  { %p1063_p10 = pnand %p1061_p9, %p1058_p8 }
  0x1b   :  { %1066 = shalt.err (!%p1063_p10)
}
  0x1c   :  { %s1067_s1 = scalar_lea.vmem %s20_s30, 128  ;;  %p1072_p12 = scmp.lt.s32.totalorder %s20_s30, %s20_s30 }
  0x1d   :  { %p1068_p11 = scmp.ne.s32.totalorder %s20_s30, %s1067_s1  ;;  %p1073_p13 = scmp.lt.s32.totalorder %s1067_s1, %s1067_s1 }
  0x1f   :  { %p1074_p0 = por %p1073_p13, %p1072_p12 }
  0x21   :  { %p1075_p1 = pnand %p1074_p0, %p1068_p11 }
  0x23   :  { %1078 = shalt.err (!%p1075_p1)
}
  0x24   :  { %22 = dma.hbm_to_vmem [thread:$0]  %s1395_s0, 128, %s20_s30, [#allocation3]  }
  0x25   :  { %s1079_s18 = scalar_lea.hbm %s1397_s2, 128 }
  0x26   :  { %p1080_p2 = scmp.ne.s32.totalorder %s1397_s2, %s1079_s18  ;;  %p1083_p3 = scmp.lt.u32.totalorder %s1079_s18, %s1397_s2 }
  0x28   :  { %p1085_p4 = pnand %p1083_p3, %p1080_p2 }
  0x2a   :  { %1088 = shalt.err (!%p1085_p4)
}
  0x2b   :  { %s1089_s23 = scalar_lea.vmem %s42_s6, 128  ;;  %p1094_p6 = scmp.lt.s32.totalorder %s42_s6, %s42_s6 }
  0x2c   :  { %p1090_p5 = scmp.ne.s32.totalorder %s42_s6, %s1089_s23  ;;  %p1095_p7 = scmp.lt.s32.totalorder %s1089_s23, %s1089_s23 }
  0x2e   :  { %p1096_p8 = por %p1095_p7, %p1094_p6 }
  0x30   :  { %p1097_p9 = pnand %p1096_p8, %p1090_p5 }
  0x32   :  { %1100 = shalt.err (!%p1097_p9)
}
  0x33   :  { %44 = dma.hbm_to_vmem [thread:$0]  %s1397_s2, 128, %s42_s6, [#allocation6]  }
  0x34   :  { %s1158_s25 = smov [#allocation8]   ;;  %s1101_s29 = scalar_lea.hbm %s1398_s3, 128 }
  0x35   :  { %s51_s26 = sshll.u32 %s1158_s25, 4  ;;  %p1102_p10 = scmp.ne.s32.totalorder %s1398_s3, %s1101_s29  ;;  %s52_s26 = int_to_ptr.vmem [resolvable:$true] %s51_s26 }
  0x36   :  { %p1105_p11 = scmp.lt.u32.totalorder %s1101_s29, %s1398_s3 }
  0x38   :  { %p1107_p12 = pnand %p1105_p11, %p1102_p10 }
  0x3a   :  { %1110 = shalt.err (!%p1107_p12)
}
  0x3b   :  { %s1111_s9 = scalar_lea.vmem %s52_s26, 128  ;;  %p1116_p0 = scmp.lt.s32.totalorder %s52_s26, %s52_s26 }
  0x3c   :  { %p1112_p13 = scmp.ne.s32.totalorder %s52_s26, %s1111_s9  ;;  %p1117_p1 = scmp.lt.s32.totalorder %s1111_s9, %s1111_s9 }
  0x3e   :  { %p1118_p2 = por %p1117_p1, %p1116_p0 }
  0x40   :  { %p1119_p3 = pnand %p1118_p2, %p1112_p13 }
  0x42   :  { %1122 = shalt.err (!%p1119_p3)
}
  0x43   :  { %54 = dma.hbm_to_vmem [thread:$0]  %s1398_s3, 128, %s52_s26, [#allocation9]  }
  0x44   :  { %1145 = dma.done.wait [#allocation3], 128  }
  0x45   :  { %1146 = vsyncadd [#allocation3], 4294967168 }
  0x46   :  { %1147 = dma.done.wait [#allocation6], 16512  }
  0x47   :  { %1148 = vsyncadd [#allocation6], 4294950784 }
  0x48   :  { %1149 = dma.done.wait [#allocation9], 128  }
  0x49   :  { %1150 = vsyncadd [#allocation9], 4294967168  ;;  %v84_v0 = vld [vmem:[#allocation5 + $0x80] sm:$0xff]  ;;  %v85_v1 = vld [vmem:[#allocation5 + $0x88] sm:$0xff]  ;;  %v1159_v21 = vmov 0   ;;  %s1160_s3 = smov [#allocation10]  }
  0x4a   :  { %v116_v2 = vld [vmem:[#allocation5 + $0x180] sm:$0xff]  ;;  %v882_v3 = vpack.c.bf16 %v85_v1, %v84_v0  ;;  %v117_v4 = vld [vmem:[#allocation5 + $0x188] sm:$0xff]  ;;  %v86_v11 = vld [vmem:[#allocation5 + $0x90] sm:$0xff]  ;;  %1018 = vset.pattern.permute.xlu0 %v1159_v21  ;;  %s727_s10 = sshll.u32 %s1160_s3, 4  ;;  %s728_s10 = int_to_ptr.vmem [resolvable:$true] %s727_s10 }
  0x4b   :  { %v68_v5 = vld [vmem:[#allocation5] sm:$0xff]  ;;  %v69_v6 = vld [vmem:[#allocation5 + $0x8] sm:$0xff]  ;;  %v914_v7 = vpack.c.bf16 %v117_v4, %v116_v2  ;;  %v87_v13 = vld [vmem:[#allocation5 + $0x98] sm:$0xff]  ;;  %s1123_s11 = scalar_lea.vmem %s728_s10, 1024  ;;  %p1128_p5 = scmp.lt.s32.totalorder %s728_s10, %s728_s10 }
  0x4c   :  { %v884_v8 = vpack.c.bf16 %v69_v6, %v68_v5  ;;  %v100_v9 = vld [vmem:[#allocation5 + $0x100] sm:$0xff]  ;;  %v101_v10 = vld [vmem:[#allocation5 + $0x108] sm:$0xff]  ;;  %883 = vmatprep.subr.bf16.mxu0 %v882_v3  ;;  %v118_v14 = vld [vmem:[#allocation5 + $0x190] sm:$0xff]  ;;  %v886_v16 = vpack.c.bf16 %v87_v13, %v86_v11  ;;  %p1124_p4 = scmp.ne.s32.totalorder %s728_s10, %s1123_s11  ;;  %p1129_p6 = scmp.lt.s32.totalorder %s1123_s11, %s1123_s11 }
  0x4d   :  { %v916_v12 = vpack.c.bf16 %v101_v10, %v100_v9  ;;  %v119_v15 = vld [vmem:[#allocation5 + $0x198] sm:$0xff]  ;;  %915 = vmatprep.subr.bf16.mxu1 %v914_v7  ;;  %v70_v18 = vld [vmem:[#allocation5 + $0x10] sm:$0xff]  ;;  %v88_v23 = vld [vmem:[#allocation5 + $0xa0] sm:$0xff] }
  0x4e   :  { %885 = vmatpush3.bf16.xpose.msra.mxu0 %v884_v8  ;;  %v918_v17 = vpack.c.bf16 %v119_v15, %v118_v14  ;;  %v71_v19 = vld [vmem:[#allocation5 + $0x18] sm:$0xff]  ;;  %v102_v20 = vld [vmem:[#allocation5 + $0x110] sm:$0xff]  ;;  %v89_v24 = vld [vmem:[#allocation5 + $0xa8] sm:$0xff]  ;;  %p1130_p7 = por %p1129_p6, %p1128_p5 }
  0x4f   :  { %917 = vmatpush3.bf16.xpose.msra.mxu1 %v916_v12  ;;  %887 = vmatprep.subr.bf16.mxu0 %v886_v16  ;;  %v103_v22 = vld [vmem:[#allocation5 + $0x118] sm:$0xff]  ;;  %v120_v25 = vld [vmem:[#allocation5 + $0x1a0] sm:$0xff]  ;;  %v121_v26 = vld [vmem:[#allocation5 + $0x1a8] sm:$0xff]  ;;  %v888_v27 = vpack.c.bf16 %v71_v19, %v70_v18  ;;  %v890_v29 = vpack.c.bf16 %v89_v24, %v88_v23 }
  0x50   :  { %919 = vmatprep.subr.bf16.mxu1 %v918_v17  ;;  %v920_v28 = vpack.c.bf16 %v103_v22, %v102_v20  ;;  %v922_v30 = vpack.c.bf16 %v121_v26, %v120_v25  ;;  %v72_v31 = vld [vmem:[#allocation5 + $0x20] sm:$0xff]  ;;  %v73_v32 = vld [vmem:[#allocation5 + $0x28] sm:$0xff]  ;;  %v90_v35 = vld [vmem:[#allocation5 + $0xb0] sm:$0xff]  ;;  %p1131_p8 = pnand %p1130_p7, %p1124_p4 }
  0x51   :  { %v104_v33 = vld [vmem:[#allocation5 + $0x120] sm:$0xff]  ;;  %v105_v34 = vld [vmem:[#allocation5 + $0x128] sm:$0xff]  ;;  %v91_v36 = vld [vmem:[#allocation5 + $0xb8] sm:$0xff]  ;;  %v892_v39 = vpack.c.bf16 %v73_v32, %v72_v31 }
  0x52   :  { %v122_v37 = vld [vmem:[#allocation5 + $0x1b0] sm:$0xff]  ;;  %v123_v38 = vld [vmem:[#allocation5 + $0x1b8] sm:$0xff]  ;;  %v924_v40 = vpack.c.bf16 %v105_v34, %v104_v33  ;;  %v894_v41 = vpack.c.bf16 %v91_v36, %v90_v35  ;;  %v92_v48 = vld [vmem:[#allocation5 + $0xc0] sm:$0xff] }
  0x53   :  { %v926_v42 = vpack.c.bf16 %v123_v38, %v122_v37  ;;  %v74_v43 = vld [vmem:[#allocation5 + $0x30] sm:$0xff]  ;;  %v75_v44 = vld [vmem:[#allocation5 + $0x38] sm:$0xff]  ;;  %v93_v49 = vld [vmem:[#allocation5 + $0xc8] sm:$0xff] }
  0x54   :  { %v106_v45 = vld [vmem:[#allocation5 + $0x130] sm:$0xff]  ;;  %v1234_v46 = vld [vmem:[#allocation2] sm:$0xff]  ;;  %v124_v50 = vld [vmem:[#allocation5 + $0x1c0] sm:$0xff]  ;;  %v896_v52 = vpack.c.bf16 %v75_v44, %v74_v43  ;;  %v898_v54 = vpack.c.bf16 %v93_v49, %v92_v48 }
  0x55   :  { %v107_v47 = vld [vmem:[#allocation5 + $0x138] sm:$0xff]  ;;  %778 = vmatprep.mubr.f32.mxu0 %v1234_v46  ;;  %v125_v51 = vld [vmem:[#allocation5 + $0x1c8] sm:$0xff]  ;;  %812 = vmatprep.mubr.f32.mxu1 %v1234_v46  ;;  %v76_v56 = vld [vmem:[#allocation5 + $0x40] sm:$0xff] }
  0x56   :  { %889 = vmatpush3.bf16.xpose.msra.mxu0 %v888_v27  ;;  %v928_v53 = vpack.c.bf16 %v107_v47, %v106_v45  ;;  %v930_v55 = vpack.c.bf16 %v125_v51, %v124_v50  ;;  %v77_v57 = vld [vmem:[#allocation5 + $0x48] sm:$0xff]  ;;  %v108_v58 = vld [vmem:[#allocation5 + $0x140] sm:$0xff]  ;;  %v94_v60 = vld [vmem:[#allocation5 + $0xd0] sm:$0xff] }
  0x57   :  { %921 = vmatpush3.bf16.xpose.msra.mxu1 %v920_v28  ;;  %891 = vmatprep.subr.bf16.mxu0 %v890_v29  ;;  %v109_v59 = vld [vmem:[#allocation5 + $0x148] sm:$0xff]  ;;  %v95_v61 = vld [vmem:[#allocation5 + $0xd8] sm:$0xff]  ;;  %v126_v62 = vld [vmem:[#allocation5 + $0x1d0] sm:$0xff]  ;;  %v900_v0 = vpack.c.bf16 %v77_v57, %v76_v56 }
  0x58   :  { %923 = vmatprep.subr.bf16.mxu1 %v922_v30  ;;  %v127_v63 = vld [vmem:[#allocation5 + $0x1d8] sm:$0xff]  ;;  %v932_v1 = vpack.c.bf16 %v109_v59, %v108_v58  ;;  %v902_v2 = vpack.c.bf16 %v95_v61, %v94_v60  ;;  %v78_v4 = vld [vmem:[#allocation5 + $0x50] sm:$0xff]  ;;  %v96_v8 = vld [vmem:[#allocation5 + $0xe0] sm:$0xff] }
  0x59   :  { %v934_v3 = vpack.c.bf16 %v127_v63, %v126_v62  ;;  %v79_v5 = vld [vmem:[#allocation5 + $0x58] sm:$0xff]  ;;  %v110_v6 = vld [vmem:[#allocation5 + $0x150] sm:$0xff]  ;;  %v97_v9 = vld [vmem:[#allocation5 + $0xe8] sm:$0xff] }
  0x5a   :  { %v111_v7 = vld [vmem:[#allocation5 + $0x158] sm:$0xff]  ;;  %v128_v10 = vld [vmem:[#allocation5 + $0x1e0] sm:$0xff]  ;;  %v129_v11 = vld [vmem:[#allocation5 + $0x1e8] sm:$0xff]  ;;  %v904_v12 = vpack.c.bf16 %v79_v5, %v78_v4  ;;  %v906_v14 = vpack.c.bf16 %v97_v9, %v96_v8 }
  0x5b   :  { %v936_v13 = vpack.c.bf16 %v111_v7, %v110_v6  ;;  %v938_v15 = vpack.c.bf16 %v129_v11, %v128_v10  ;;  %v197_v16 = vld [vmem:[#allocation8] sm:$0xff]  ;;  %v80_v17 = vld [vmem:[#allocation5 + $0x60] sm:$0xff]  ;;  %v98_v21 = vld [vmem:[#allocation5 + $0xf0] sm:$0xff] }
  0x5c   :  { %687 = vperm.xlu0 %1018, %v197_v16   ;;  %v81_v18 = vld [vmem:[#allocation5 + $0x68] sm:$0xff]  ;;  %v112_v19 = vld [vmem:[#allocation5 + $0x160] sm:$0xff]  ;;  %v99_v22 = vld [vmem:[#allocation5 + $0xf8] sm:$0xff] }
  0x5d   :  { %v113_v20 = vld [vmem:[#allocation5 + $0x168] sm:$0xff]  ;;  %v130_v23 = vld [vmem:[#allocation5 + $0x1f0] sm:$0xff]  ;;  %v131_v24 = vld [vmem:[#allocation5 + $0x1f8] sm:$0xff]  ;;  %v908_v25 = vpack.c.bf16 %v81_v18, %v80_v17  ;;  %v910_v27 = vpack.c.bf16 %v99_v22, %v98_v21 }
  0x5e   :  { %893 = vmatpush3.bf16.xpose.msra.mxu0 %v892_v39  ;;  %v940_v26 = vpack.c.bf16 %v113_v20, %v112_v19  ;;  %v942_v28 = vpack.c.bf16 %v131_v24, %v130_v23  ;;  %v82_v29 = vld [vmem:[#allocation5 + $0x70] sm:$0xff]  ;;  %v83_v30 = vld [vmem:[#allocation5 + $0x78] sm:$0xff]  ;;  %v148_v33 = vld [vmem:[#allocation5 + $0x280] sm:$0xff] }
  0x5f   :  { %925 = vmatpush3.bf16.xpose.msra.mxu1 %v924_v40  ;;  %895 = vmatprep.subr.bf16.mxu0 %v894_v41  ;;  %v114_v31 = vld [vmem:[#allocation5 + $0x170] sm:$0xff]  ;;  %v115_v32 = vld [vmem:[#allocation5 + $0x178] sm:$0xff]  ;;  %v149_v34 = vld [vmem:[#allocation5 + $0x288] sm:$0xff]  ;;  %v912_v37 = vpack.c.bf16 %v83_v30, %v82_v29 }
  0x60   :  { %927 = vmatprep.subr.bf16.mxu1 %v926_v42  ;;  %v180_v35 = vld [vmem:[#allocation5 + $0x380] sm:$0xff]  ;;  %v181_v36 = vld [vmem:[#allocation5 + $0x388] sm:$0xff]  ;;  %v944_v38 = vpack.c.bf16 %v115_v32, %v114_v31  ;;  %v946_v39 = vpack.c.bf16 %v149_v34, %v148_v33  ;;  %v150_v45 = vld [vmem:[#allocation5 + $0x290] sm:$0xff] }
  0x61   :  { %v978_v40 = vpack.c.bf16 %v181_v36, %v180_v35  ;;  %v132_v41 = vld [vmem:[#allocation5 + $0x200] sm:$0xff]  ;;  %v133_v42 = vld [vmem:[#allocation5 + $0x208] sm:$0xff]  ;;  %v151_v47 = vld [vmem:[#allocation5 + $0x298] sm:$0xff] }
  0x62   :  { %v164_v43 = vld [vmem:[#allocation5 + $0x300] sm:$0xff]  ;;  %v165_v44 = vld [vmem:[#allocation5 + $0x308] sm:$0xff]  ;;  %v182_v48 = vld [vmem:[#allocation5 + $0x390] sm:$0xff]  ;;  %v948_v50 = vpack.c.bf16 %v133_v42, %v132_v41 }
  0x63   :  { %v183_v49 = vld [vmem:[#allocation5 + $0x398] sm:$0xff]  ;;  %v980_v51 = vpack.c.bf16 %v165_v44, %v164_v43  ;;  %v166_v56 = vld [vmem:[#allocation5 + $0x310] sm:$0xff]  ;;  %v152_v58 = vld [vmem:[#allocation5 + $0x2a0] sm:$0xff] }
  0x64   :  { %v167_v57 = vld [vmem:[#allocation5 + $0x318] sm:$0xff]  ;;  %v153_v59 = vld [vmem:[#allocation5 + $0x2a8] sm:$0xff]  ;;  %v184_v60 = vld [vmem:[#allocation5 + $0x3a0] sm:$0xff] }
  0x65   :  { %v185_v61 = vld [vmem:[#allocation5 + $0x3a8] sm:$0xff]  ;;  %v984_v63 = vpack.c.bf16 %v167_v57, %v166_v56  ;;  %v168_v4 = vld [vmem:[#allocation5 + $0x320] sm:$0xff]  ;;  %v154_v6 = vld [vmem:[#allocation5 + $0x2b0] sm:$0xff] }
  0x66   :  { %897 = vmatpush3.bf16.xpose.msra.mxu0 %v896_v52  ;;  %v950_v52 = vpack.c.bf16 %v151_v47, %v150_v45  ;;  %v169_v5 = vld [vmem:[#allocation5 + $0x328] sm:$0xff]  ;;  %v155_v7 = vld [vmem:[#allocation5 + $0x2b8] sm:$0xff]  ;;  %v186_v8 = vld [vmem:[#allocation5 + $0x3b0] sm:$0xff] }
  0x67   :  { %929 = vmatpush3.bf16.xpose.msra.mxu1 %v928_v53  ;;  %899 = vmatprep.subr.bf16.mxu0 %v898_v54  ;;  %v982_v53 = vpack.c.bf16 %v183_v49, %v182_v48  ;;  %v134_v54 = vld [vmem:[#allocation5 + $0x210] sm:$0xff]  ;;  %v187_v9 = vld [vmem:[#allocation5 + $0x3b8] sm:$0xff]  ;;  %v988_v11 = vpack.c.bf16 %v169_v5, %v168_v4  ;;  %v156_v18 = vld [vmem:[#allocation5 + $0x2c0] sm:$0xff]  ;;  %v483_v5 = vlaneseq }
  0x68   :  { %931 = vmatprep.subr.bf16.mxu1 %v930_v55  ;;  %v135_v55 = vld [vmem:[#allocation5 + $0x218] sm:$0xff]  ;;  %v170_v16 = vld [vmem:[#allocation5 + $0x330] sm:$0xff]  ;;  %v157_v19 = vld [vmem:[#allocation5 + $0x2c8] sm:$0xff] }
  0x69   :  { %v952_v62 = vpack.c.bf16 %v135_v55, %v134_v54  ;;  %v171_v17 = vld [vmem:[#allocation5 + $0x338] sm:$0xff]  ;;  %v188_v20 = vld [vmem:[#allocation5 + $0x3c0] sm:$0xff]  ;;  %v189_v21 = vld [vmem:[#allocation5 + $0x3c8] sm:$0xff]  ;;  %v962_v24 = vpack.c.bf16 %v157_v19, %v156_v18 }
  0x6a   :  { %v992_v23 = vpack.c.bf16 %v171_v17, %v170_v16  ;;  %v173_v29 = vld [vmem:[#allocation5 + $0x348] sm:$0xff]  ;;  %v158_v30 = vld [vmem:[#allocation5 + $0x2d0] sm:$0xff]  ;;  %v159_v31 = vld [vmem:[#allocation5 + $0x2d8] sm:$0xff] }
  0x6b   :  { %v190_v32 = vld [vmem:[#allocation5 + $0x3d0] sm:$0xff]  ;;  %v191_v33 = vld [vmem:[#allocation5 + $0x3d8] sm:$0xff]  ;;  %v966_v36 = vpack.c.bf16 %v159_v31, %v158_v30  ;;  %v160_v42 = vld [vmem:[#allocation5 + $0x2e0] sm:$0xff] }
  0x6c   :  { %v175_v41 = vld [vmem:[#allocation5 + $0x358] sm:$0xff]  ;;  %v161_v43 = vld [vmem:[#allocation5 + $0x2e8] sm:$0xff]  ;;  %v192_v44 = vld [vmem:[#allocation5 + $0x3e0] sm:$0xff] }
  0x6d   :  { %v193_v45 = vld [vmem:[#allocation5 + $0x3e8] sm:$0xff]  ;;  %v970_v49 = vpack.c.bf16 %v161_v43, %v160_v42  ;;  %v162_v55 = vld [vmem:[#allocation5 + $0x2f0] sm:$0xff]  ;;  %v163_v56 = vld [vmem:[#allocation5 + $0x2f8] sm:$0xff] }
  0x6e   :  { %901 = vmatpush3.bf16.xpose.msra.mxu0 %v900_v0  ;;  %v954_v0 = vpack.c.bf16 %v153_v59, %v152_v58  ;;  %v177_v54 = vld [vmem:[#allocation5 + $0x368] sm:$0xff]  ;;  %v194_v57 = vld [vmem:[#allocation5 + $0x3f0] sm:$0xff]  ;;  %v195_v58 = vld [vmem:[#allocation5 + $0x3f8] sm:$0xff] }
  0x6f   :  { %933 = vmatpush3.bf16.xpose.msra.mxu1 %v932_v1  ;;  %903 = vmatprep.subr.bf16.mxu0 %v902_v2  ;;  %v986_v1 = vpack.c.bf16 %v185_v61, %v184_v60  ;;  %v136_v2 = vld [vmem:[#allocation5 + $0x220] sm:$0xff]  ;;  %v974_v61 = vpack.c.bf16 %v163_v56, %v162_v55 }
  0x70   :  { %935 = vmatprep.subr.bf16.mxu1 %v934_v3  ;;  %v137_v3 = vld [vmem:[#allocation5 + $0x228] sm:$0xff] }
  0x71   :  { %v956_v10 = vpack.c.bf16 %v137_v3, %v136_v2  ;;  %v179_v2 = vld [vmem:[#allocation5 + $0x378] sm:$0xff] }
  0x76   :  { %905 = vmatpush3.bf16.xpose.msra.mxu0 %v904_v12  ;;  %v958_v12 = vpack.c.bf16 %v155_v7, %v154_v6  ;;  %v1244_v6 = vshrl.u32 %v483_v5, 7 }
  0x77   :  { %937 = vmatpush3.bf16.xpose.msra.mxu1 %v936_v13  ;;  %907 = vmatprep.subr.bf16.mxu0 %v906_v14  ;;  %v990_v13 = vpack.c.bf16 %v187_v9, %v186_v8  ;;  %v138_v14 = vld [vmem:[#allocation5 + $0x230] sm:$0xff]  ;;  %v1247_v8 = vld [vmem:[#allocation7] sm:$0xff] }
  0x78   :  { %939 = vmatprep.subr.bf16.mxu1 %v938_v15  ;;  %v139_v15 = vld [vmem:[#allocation5 + $0x238] sm:$0xff]  ;;  %v485_v7 = vsub.s32 0, %v1244_v6  ;;  %v493_v9 = vsub.s32 2, %v1244_v6 }
  0x79   :  { %v960_v22 = vpack.c.bf16 %v139_v15, %v138_v14  ;;  %v497_v14 = vsub.s32 3, %v1244_v6 }
  0x7e   :  { %909 = vmatpush3.bf16.xpose.msra.mxu0 %v908_v25  ;;  %v994_v25 = vpack.c.bf16 %v189_v21, %v188_v20  ;;  %v498_v21 = vrot.slane %v1247_v8, %v497_v14 }
  0x7f   :  { %941 = vmatpush3.bf16.xpose.msra.mxu1 %v940_v26  ;;  %911 = vmatprep.subr.bf16.mxu0 %v910_v27  ;;  %v140_v26 = vld [vmem:[#allocation5 + $0x240] sm:$0xff]  ;;  %v141_v27 = vld [vmem:[#allocation5 + $0x248] sm:$0xff] }
  0x80   :  { %943 = vmatprep.subr.bf16.mxu1 %v942_v28  ;;  %v172_v28 = vld [vmem:[#allocation5 + $0x340] sm:$0xff]  ;;  %v964_v34 = vpack.c.bf16 %v141_v27, %v140_v26 }
  0x81   :  { %v996_v35 = vpack.c.bf16 %v173_v29, %v172_v28 }
  0x86   :  { %913 = vmatpush3.bf16.xpose.msra.mxu0 %v912_v37  ;;  %v998_v37 = vpack.c.bf16 %v191_v33, %v190_v32 }
  0x87   :  { %945 = vmatpush3.bf16.xpose.msra.mxu1 %v944_v38  ;;  %947 = vmatprep.subr.bf16.mxu0 %v946_v39  ;;  %v142_v38 = vld [vmem:[#allocation5 + $0x250] sm:$0xff]  ;;  %v143_v39 = vld [vmem:[#allocation5 + $0x258] sm:$0xff] }
  0x88   :  { %979 = vmatprep.subr.bf16.mxu1 %v978_v40  ;;  %v174_v40 = vld [vmem:[#allocation5 + $0x350] sm:$0xff]  ;;  %v968_v47 = vpack.c.bf16 %v143_v39, %v142_v38 }
  0x89   :  { %v1000_v48 = vpack.c.bf16 %v175_v41, %v174_v40 }
  0x8d   :  { %779 = vmatmul.mubr.f32.vlgmr.msra.gmra.mrb[0].mxu0 %v1234_v46 }
  0x8e   :  { %813 = vmatmul.mubr.f32.vlgmr.msra.gmra.mrb[0].mxu1 %v1234_v46  ;;  %949 = vmatpush3.bf16.xpose.msra.mxu0 %v948_v50  ;;  %v1002_v50 = vpack.c.bf16 %v193_v45, %v192_v44 }
  0x8f   :  { %981 = vmatpush3.bf16.xpose.msra.mxu1 %v980_v51  ;;  %951 = vmatprep.subr.bf16.mxu0 %v950_v52  ;;  %v144_v51 = vld [vmem:[#allocation5 + $0x260] sm:$0xff]  ;;  %v145_v52 = vld [vmem:[#allocation5 + $0x268] sm:$0xff] }
  0x90   :  { %983 = vmatprep.subr.bf16.mxu1 %v982_v53  ;;  %846 = vmatprep.mubr.f32.mxu0 %v1234_v46  ;;  %v176_v53 = vld [vmem:[#allocation5 + $0x360] sm:$0xff]  ;;  %v972_v59 = vpack.c.bf16 %v145_v52, %v144_v51 }
  0x91   :  { %880 = vmatprep.mubr.f32.mxu1 %v1234_v46  ;;  %v1004_v60 = vpack.c.bf16 %v177_v54, %v176_v53 }
  0x96   :  { %953 = vmatpush3.bf16.xpose.msra.mxu0 %v952_v62  ;;  %v1006_v62 = vpack.c.bf16 %v195_v58, %v194_v57 }
  0x97   :  { %985 = vmatpush3.bf16.xpose.msra.mxu1 %v984_v63  ;;  %955 = vmatprep.subr.bf16.mxu0 %v954_v0  ;;  %v146_v63 = vld [vmem:[#allocation5 + $0x270] sm:$0xff]  ;;  %v147_v0 = vld [vmem:[#allocation5 + $0x278] sm:$0xff] }
  0x98   :  { %987 = vmatprep.subr.bf16.mxu1 %v986_v1  ;;  %v178_v1 = vld [vmem:[#allocation5 + $0x370] sm:$0xff]  ;;  %v976_v3 = vpack.c.bf16 %v147_v0, %v146_v63 }
  0x99   :  { %v1008_v4 = vpack.c.bf16 %v179_v2, %v178_v1 }
  0x9e   :  { %957 = vmatpush3.bf16.xpose.msra.mxu0 %v956_v10  ;;  %v489_v10 = vsub.s32 1, %v1244_v6 }
  0x9f   :  { %989 = vmatpush3.bf16.xpose.msra.mxu1 %v988_v11  ;;  %959 = vmatprep.subr.bf16.mxu0 %v958_v12  ;;  %v486_v11 = vrot.slane %v1247_v8, %v485_v7  ;;  %v494_v12 = vrot.slane %v1247_v8, %v493_v9 }
  0xa0   :  { %991 = vmatprep.subr.bf16.mxu1 %v990_v13  ;;  %v490_v13 = vrot.slane %v1247_v8, %v489_v10 }
  0xa6   :  { %961 = vmatpush3.bf16.xpose.msra.mxu0 %v960_v22 }
  0xa7   :  { %993 = vmatpush3.bf16.xpose.msra.mxu1 %v992_v23  ;;  %963 = vmatprep.subr.bf16.mxu0 %v962_v24 }
  0xa8   :  { %995 = vmatprep.subr.bf16.mxu1 %v994_v25 }
  0xae   :  { %965 = vmatpush3.bf16.xpose.msra.mxu0 %v964_v34 }
  0xaf   :  { %997 = vmatpush3.bf16.xpose.msra.mxu1 %v996_v35  ;;  %967 = vmatprep.subr.bf16.mxu0 %v966_v36  ;;  %v1272_v36 = vand.u32 127, %v483_v5 }
  0xb0   :  { %999 = vmatprep.subr.bf16.mxu1 %v998_v37 }
  0xb1   :  { %v670_v40 = vadd.s32 256, %v1272_v36  ;;  %v1278_v42 = vadd.s32 128, %v1272_v36  ;;  %v1281_v44 = vadd.s32 384, %v1272_v36 }
  0xb6   :  { %969 = vmatpush3.bf16.xpose.msra.mxu0 %v968_v47 }
  0xb7   :  { %1001 = vmatpush3.bf16.xpose.msra.mxu1 %v1000_v48  ;;  %971 = vmatprep.subr.bf16.mxu0 %v970_v49 }
  0xb8   :  { %1003 = vmatprep.subr.bf16.mxu1 %v1002_v50 }
  0xbe   :  { %973 = vmatpush3.bf16.xpose.msra.mxu0 %v972_v59 }
  0xbf   :  { %1005 = vmatpush3.bf16.xpose.msra.mxu1 %v1004_v60  ;;  %975 = vmatprep.subr.bf16.mxu0 %v974_v61 }
  0xc0   :  { %1007 = vmatprep.subr.bf16.mxu1 %v1006_v62 }
  0xc6   :  { %977 = vmatpush3.bf16.xpose.msra.mxu0 %v976_v3 }
  0xc7   :  { %1009 = vmatpush3.bf16.xpose.msra.mxu1 %v1008_v4 }
  0xcd   :  { %847 = vmatmul.mubr.f32.vlgmr.msra.gmra.mrb[2].mxu0 %v1234_v46 }
  0xce   :  { %881 = vmatmul.mubr.f32.vlgmr.msra.gmra.mrb[2].mxu1 %v1234_v46 }
  0xdb   :  { %v1275_v41 = vpop.permute.xlu0 %687 }
  0xdc   :  { %vm689_vm0 = vcmp.eq.s32.totalorder %v1275_v41, %v1272_v36  ;;  %vm691_vm1 = vcmp.eq.s32.totalorder %v1275_v41, %v670_v40  ;;  %vm690_vm6 = vcmp.eq.s32.totalorder %v1275_v41, %v1278_v42  ;;  %vm692_vm14 = vcmp.eq.s32.totalorder %v1275_v41, %v1281_v44 }
 0x160   :  { %v264_v46 = vpop.f32.mrb[0].mxu0 }
 0x161   :  { %v1255_v15 = vmul.f32 %v486_v11, %v264_v46  ;;  %v335_v16 = vpop.f32.mrb[0].mxu1  ;;  %v266_v17 = vpop.f32.mrb[1].mxu0 }
 0x162   :  { %v1257_v18 = vmul.f32 %v494_v12, %v335_v16  ;;  %v1259_v19 = vmul.f32 %v490_v13, %v266_v17  ;;  %v337_v20 = vpop.f32.mrb[1].mxu1 }
 0x163   :  { %v531_v22 = vmul.f32 %v1255_v15, %v1255_v15  ;;  %v1268_v27 = vmul.f32 %v498_v21, %v337_v20  ;;  %v619_v48 = vmul.f32 0.87758255, %v1255_v15  ;;  %vm643_vm2 = vcmp.gt.f32.partialorder %v1255_v15, -0.87758255 }
 0x164   :  { %v533_v23 = vmul.f32 %v1257_v18, %v1257_v18  ;;  %v532_v25 = vmul.f32 %v1259_v19, %v1259_v19  ;;  %v738_v49 = vadd.f32 -0.23971277, %v1255_v15  ;;  %v621_v52 = vmul.f32 0.87758255, %v1257_v18 }
 0x165   :  { %v539_v24 = vsub.f32 1.0, %v531_v22  ;;  %v534_v31 = vmul.f32 %v1268_v27, %v1268_v27  ;;  %vm645_vm8 = vcmp.gt.f32.partialorder %v1257_v18, -0.87758255  ;;  %v740_v60 = vadd.f32 -0.23971277, %v1257_v18 }
 0x166   :  { %v541_v26 = vsub.f32 1.0, %v533_v23  ;;  %v540_v29 = vsub.f32 1.0, %v532_v25  ;;  %v620_v0 = vmul.f32 0.87758255, %v1259_v19  ;;  %vm644_vm11 = vcmp.gt.f32.partialorder %v1259_v19, -0.87758255 }
 0x167   :  { %v547_v28 = vmax.f32 %v539_v24, 0.0  ;;  %v542_v35 = vsub.f32 1.0, %v534_v31  ;;  %v739_v7 = vadd.f32 -0.23971277, %v1259_v19  ;;  %v622_v22 = vmul.f32 0.87758255, %v1268_v27 }
 0x168   :  { %v549_v30 = vmax.f32 %v541_v26, 0.0  ;;  %v548_v33 = vmax.f32 %v540_v29, 0.0  ;;  %vm646_vm15 = vcmp.gt.f32.partialorder %v1268_v27, -0.87758255 }
 0x169   :  { %v555_v32 = vmin.f32 %v547_v28, 1.0  ;;  %v550_v38 = vmax.f32 %v542_v35, 0.0  ;;  %v741_v28 = vadd.f32 -0.23971277, %v1268_v27 }
 0x16a   :  { %v557_v34 = vmin.f32 %v549_v30, 1.0  ;;  %v556_v37 = vmin.f32 %v548_v33, 1.0  ;;  %v509_v33 = vsub.s32 6, %v1244_v6 }
 0x16b   :  { %1019 = vrsqrt.f32 %v555_v32  ;;  %v558_v39 = vmin.f32 %v550_v38, 1.0  ;;  %vm565_vm3 = vcmp.eq.f32.partialorder %v555_v32, inf  ;;  %v568_v50 = vand.u32 2147483648, %v555_v32 }
 0x16c   :  { %1021 = vrsqrt.f32 %v557_v34  ;;  %vm567_vm4 = vcmp.eq.f32.partialorder %v555_v32, 0.0  ;;  %vm579_vm5 = vcmp.eq.f32.partialorder %v557_v34, inf  ;;  %v582_v54 = vand.u32 2147483648, %v557_v34 }
 0x16d   :  { %1023 = vrsqrt.f32 %v556_v37  ;;  %vm581_vm7 = vcmp.eq.f32.partialorder %v557_v34, 0.0  ;;  %vm572_vm9 = vcmp.eq.f32.partialorder %v556_v37, inf  ;;  %v575_v63 = vand.u32 2147483648, %v556_v37 }
 0x16e   :  { %1025 = vrsqrt.f32 %v558_v39  ;;  %vm574_vm10 = vcmp.eq.f32.partialorder %v556_v37, 0.0  ;;  %vm586_vm12 = vcmp.eq.f32.partialorder %v558_v39, inf  ;;  %v589_v12 = vand.u32 2147483648, %v558_v39 }
 0x16f   :  { %vm588_vm13 = vcmp.eq.f32.partialorder %v558_v39, 0.0  ;;  %v513_v38 = vsub.s32 7, %v1244_v6 }
 0x175   :  { %v1020_v43 = vpop.eup %1019 }
 0x176   :  { %v1022_v45 = vpop.eup %1021  ;;  %v564_v47 = vmul.f32 %v1020_v43, %v555_v32 }
 0x177   :  { %v578_v51 = vmul.f32 %v1022_v45, %v557_v34  ;;  %v1024_v55 = vpop.eup %1023 }
 0x178   :  { %v566_v53 = vsel %vm565_vm3, %v555_v32, %v564_v47  ;;  %v571_v61 = vmul.f32 %v1024_v55, %v556_v37  ;;  %v1026_v1 = vpop.eup %1025  ;;  %v501_v32 = vsub.s32 4, %v1244_v6  ;;  %v514_v47 = vrot.slane %v1247_v8, %v513_v38 }
 0x179   :  { %v569_v56 = vsel %vm567_vm4, %v568_v50, %v566_v53  ;;  %v580_v57 = vsel %vm579_vm5, %v557_v34, %v578_v51  ;;  %v585_v9 = vmul.f32 %v1026_v1, %v558_v39  ;;  %v505_v34 = vsub.s32 5, %v1244_v6 }
 0x17a   :  { %v627_v58 = vmul.f32 0.47942555, %v569_v56  ;;  %v583_v59 = vsel %vm581_vm7, %v582_v54, %v580_v57  ;;  %v573_v3 = vsel %vm572_vm9, %v556_v37, %v571_v61  ;;  %v502_v35 = vrot.slane %v1247_v8, %v501_v32 }
 0x17b   :  { %v629_v62 = vmul.f32 0.47942555, %v583_v59  ;;  %v576_v5 = vsel %vm574_vm10, %v575_v63, %v573_v3  ;;  %v587_v14 = vsel %vm586_vm12, %v558_v39, %v585_v9  ;;  %v506_v37 = vrot.slane %v1247_v8, %v505_v34 }
 0x17c   :  { %v635_v2 = vsub.f32 %v619_v48, %v627_v58  ;;  %v628_v11 = vmul.f32 0.47942555, %v576_v5  ;;  %v590_v17 = vsel %vm588_vm13, %v589_v12, %v587_v14  ;;  %v672_v63 = vadd.s32 512, %v1272_v36 }
 0x17d   :  { %v637_v4 = vsub.f32 %v621_v52, %v629_v62  ;;  %v630_v23 = vmul.f32 0.47942555, %v590_v17  ;;  %v673_v1 = vadd.s32 640, %v1272_v36  ;;  %v1350_v3 = vadd.s32 896, %v1272_v36 }
 0x17e   :  { %v659_v10 = vsel %vm643_vm2, %v635_v2, %v738_v49  ;;  %v636_v16 = vsub.f32 %v620_v0, %v628_v11  ;;  %v674_v0 = vadd.s32 768, %v1272_v36 }
 0x17f   :  { %v661_v13 = vsel %vm645_vm8, %v637_v4, %v740_v60  ;;  %v697_v46 = vsel %vm689_vm0, %v659_v10, %v1255_v15  ;;  %v638_v26 = vsub.f32 %v622_v22, %v630_v23  ;;  %vm693_vm0 = vcmp.eq.s32.totalorder %v1275_v41, %v672_v63 }
 0x180   :  { %v699_v20 = vsel %vm691_vm1, %v661_v13, %v1257_v18  ;;  %v705_v21 = vmul.f32 64.0, %v697_v46  ;;  %v660_v25 = vsel %vm644_vm11, %v636_v16, %v739_v7  ;;  %vm695_vm1 = vcmp.eq.s32.totalorder %v1275_v41, %v674_v0 }
 0x181   :  { %v707_v24 = vmul.f32 64.0, %v699_v20  ;;  %v698_v15 = vsel %vm690_vm6, %v660_v25, %v1259_v19  ;;  %v662_v29 = vsel %vm646_vm15, %v638_v26, %v741_v28  ;;  %v510_v19 = vrot.slane %v1247_v8, %v509_v33 }
 0x182   :  { %713 = vst [vmem:[#allocation10] sm:$0xff] %v705_v21  ;;  %v706_v18 = vmul.f32 64.0, %v698_v15  ;;  %v700_v30 = vsel %vm692_vm14, %v662_v29, %v1268_v27  ;;  %vm694_vm6 = vcmp.eq.s32.totalorder %v1275_v41, %v673_v1  ;;  %vm696_vm14 = vcmp.eq.s32.totalorder %v1275_v41, %v1350_v3 }
 0x183   :  { %715 = vst [vmem:[#allocation10 + $0x10] sm:$0xff] %v707_v24  ;;  %v708_v31 = vmul.f32 64.0, %v700_v30 }
 0x184   :  { %714 = vst [vmem:[#allocation10 + $0x8] sm:$0xff] %v706_v18 }
 0x185   :  { %716 = vst [vmem:[#allocation10 + $0x18] sm:$0xff] %v708_v31 }
 0x1a0   :  { %v406_v39 = vpop.f32.mrb[2].mxu0 }
 0x1a1   :  { %v1327_v40 = vmul.f32 %v502_v35, %v406_v39  ;;  %v477_v27 = vpop.f32.mrb[2].mxu1  ;;  %v408_v42 = vpop.f32.mrb[3].mxu0 }
 0x1a2   :  { %v1329_v43 = vmul.f32 %v510_v19, %v477_v27  ;;  %v1331_v44 = vmul.f32 %v506_v37, %v408_v42  ;;  %v479_v45 = vpop.f32.mrb[3].mxu1 }
 0x1a3   :  { %v535_v48 = vmul.f32 %v1327_v40, %v1327_v40  ;;  %v1340_v52 = vmul.f32 %v514_v47, %v479_v45  ;;  %v623_v7 = vmul.f32 0.87758255, %v1327_v40  ;;  %vm647_vm2 = vcmp.gt.f32.partialorder %v1327_v40, -0.87758255 }
 0x1a4   :  { %v537_v49 = vmul.f32 %v1329_v43, %v1329_v43  ;;  %v536_v6 = vmul.f32 %v1331_v44, %v1331_v44  ;;  %v742_v9 = vadd.f32 -0.23971277, %v1327_v40  ;;  %v625_v12 = vmul.f32 0.87758255, %v1329_v43 }
 0x1a5   :  { %v543_v50 = vsub.f32 1.0, %v535_v48  ;;  %v538_v56 = vmul.f32 %v1340_v52, %v1340_v52  ;;  %vm649_vm8 = vcmp.gt.f32.partialorder %v1329_v43, -0.87758255  ;;  %v744_v21 = vadd.f32 -0.23971277, %v1329_v43 }
 0x1a6   :  { %v545_v51 = vsub.f32 1.0, %v537_v49  ;;  %v544_v54 = vsub.f32 1.0, %v536_v6  ;;  %v624_v25 = vmul.f32 0.87758255, %v1331_v44  ;;  %vm648_vm11 = vcmp.gt.f32.partialorder %v1331_v44, -0.87758255 }
 0x1a7   :  { %v551_v53 = vmax.f32 %v543_v50, 0.0  ;;  %v546_v59 = vsub.f32 1.0, %v538_v56  ;;  %v743_v30 = vadd.f32 -0.23971277, %v1331_v44  ;;  %v626_v47 = vmul.f32 0.87758255, %v1340_v52 }
 0x1a8   :  { %v553_v55 = vmax.f32 %v545_v51, 0.0  ;;  %v552_v57 = vmax.f32 %v544_v54, 0.0  ;;  %v745_v6 = vadd.f32 -0.23971277, %v1340_v52  ;;  %vm650_vm15 = vcmp.gt.f32.partialorder %v1340_v52, -0.87758255 }
 0x1a9   :  { %v559_v8 = vmin.f32 %v551_v53, 1.0  ;;  %v554_v61 = vmax.f32 %v546_v59, 0.0 }
 0x1aa   :  { %v561_v58 = vmin.f32 %v553_v55, 1.0  ;;  %v560_v60 = vmin.f32 %v552_v57, 1.0 }
 0x1ab   :  { %1027 = vrsqrt.f32 %v559_v8  ;;  %v562_v62 = vmin.f32 %v554_v61, 1.0  ;;  %vm593_vm3 = vcmp.eq.f32.partialorder %v559_v8, inf  ;;  %v596_v10 = vand.u32 2147483648, %v559_v8 }
 0x1ac   :  { %1029 = vrsqrt.f32 %v561_v58  ;;  %vm595_vm4 = vcmp.eq.f32.partialorder %v559_v8, 0.0  ;;  %vm607_vm5 = vcmp.eq.f32.partialorder %v561_v58, inf  ;;  %v610_v14 = vand.u32 2147483648, %v561_v58 }
 0x1ad   :  { %1031 = vrsqrt.f32 %v560_v60  ;;  %vm609_vm7 = vcmp.eq.f32.partialorder %v561_v58, 0.0  ;;  %vm600_vm9 = vcmp.eq.f32.partialorder %v560_v60, inf  ;;  %v603_v24 = vand.u32 2147483648, %v560_v60 }
 0x1ae   :  { %1033 = vrsqrt.f32 %v562_v62  ;;  %vm602_vm10 = vcmp.eq.f32.partialorder %v560_v60, 0.0  ;;  %vm614_vm12 = vcmp.eq.f32.partialorder %v562_v62, inf  ;;  %v617_v34 = vand.u32 2147483648, %v562_v62 }
 0x1af   :  { %vm616_vm13 = vcmp.eq.f32.partialorder %v562_v62, 0.0 }
 0x1b5   :  { %v1028_v2 = vpop.eup %1027 }
 0x1b6   :  { %v1030_v4 = vpop.eup %1029  ;;  %v592_v5 = vmul.f32 %v1028_v2, %v559_v8 }
 0x1b7   :  { %v606_v11 = vmul.f32 %v1030_v4, %v561_v58  ;;  %v1032_v36 = vpop.eup %1031 }
 0x1b8   :  { %v594_v13 = vsel %vm593_vm3, %v559_v8, %v592_v5  ;;  %v599_v22 = vmul.f32 %v1032_v36, %v560_v60  ;;  %v1034_v26 = vpop.eup %1033 }
 0x1b9   :  { %v597_v46 = vsel %vm595_vm4, %v596_v10, %v594_v13  ;;  %v608_v16 = vsel %vm607_vm5, %v561_v58, %v606_v11  ;;  %v613_v31 = vmul.f32 %v1034_v26, %v562_v62 }
 0x1ba   :  { %v631_v17 = vmul.f32 0.47942555, %v597_v46  ;;  %v611_v20 = vsel %vm609_vm7, %v610_v14, %v608_v16  ;;  %v601_v15 = vsel %vm600_vm9, %v560_v60, %v599_v22 }
 0x1bb   :  { %v633_v23 = vmul.f32 0.47942555, %v611_v20  ;;  %v604_v29 = vsel %vm602_vm10, %v603_v24, %v601_v15  ;;  %v615_v37 = vsel %vm614_vm12, %v562_v62, %v613_v31 }
 0x1bc   :  { %v639_v28 = vsub.f32 %v623_v7, %v631_v17  ;;  %v632_v33 = vmul.f32 0.47942555, %v604_v29  ;;  %v618_v42 = vsel %vm616_vm13, %v617_v34, %v615_v37 }
 0x1bd   :  { %v641_v18 = vsub.f32 %v625_v12, %v633_v23  ;;  %v634_v48 = vmul.f32 0.47942555, %v618_v42 }
 0x1be   :  { %v663_v32 = vsel %vm647_vm2, %v639_v28, %v742_v9  ;;  %v640_v27 = vsub.f32 %v624_v25, %v632_v33 }
 0x1bf   :  { %v701_v35 = vsel %vm693_vm0, %v663_v32, %v1327_v40  ;;  %v665_v19 = vsel %vm649_vm8, %v641_v18, %v744_v21  ;;  %v642_v50 = vsub.f32 %v626_v47, %v634_v48 }
 0x1c0   :  { %v709_v38 = vmul.f32 64.0, %v701_v35  ;;  %v703_v39 = vsel %vm695_vm1, %v665_v19, %v1329_v43  ;;  %v664_v40 = vsel %vm648_vm11, %v640_v27, %v743_v30 }
 0x1c1   :  { %v711_v45 = vmul.f32 64.0, %v703_v39  ;;  %v702_v49 = vsel %vm694_vm6, %v664_v40, %v1331_v44  ;;  %v666_v51 = vsel %vm650_vm15, %v642_v50, %v745_v6 }
 0x1c2   :  { %717 = vst [vmem:[#allocation10 + $0x20] sm:$0xff] %v709_v38  ;;  %v710_v43 = vmul.f32 64.0, %v702_v49  ;;  %v704_v53 = vsel %vm696_vm14, %v666_v51, %v1340_v52 }
 0x1c3   :  { %719 = vst [vmem:[#allocation10 + $0x30] sm:$0xff] %v711_v45  ;;  %v712_v54 = vmul.f32 64.0, %v704_v53 }
 0x1c4   :  { %718 = vst [vmem:[#allocation10 + $0x28] sm:$0xff] %v710_v43 }
 0x1c5   :  { %720 = vst [vmem:[#allocation10 + $0x38] sm:$0xff] %v712_v54 }
 0x1c6   :  { %1134 = shalt.err (!%p1131_p8)
}
 0x1c7   :  { %s1135_s1 = scalar_lea.hbm %s1399_s4, 1024 }
 0x1c8   :  { %p1136_p9 = scmp.ne.s32.totalorder %s1399_s4, %s1135_s1  ;;  %p1139_p10 = scmp.lt.u32.totalorder %s1135_s1, %s1399_s4 }
 0x1ca   :  { %p1141_p11 = pnand %p1139_p10, %p1136_p9 }
 0x1cc   :  { %1144 = shalt.err (!%p1141_p11)
}
 0x1cd   :  { %730 = dma.vmem_to_hbm [thread:$0]  %s728_s10, 1024, %s1399_s4, [#allocation4]  }
 0x1ce   :  { %1151 = dma.done.wait [#allocation4], 1024  }
 0x1cf   :  { %1152 = vsyncadd [#allocation4], 4294966272 }
 0x1d0   :  { %734 = vsyncpa [#allocation3], 1 }
 0x1d1   :  { %735 = vsyncpa [#allocation6], 1 }
 0x1d2   :  { %736 = vsyncpa [#allocation9], 1 }
 0x1d3   :  { %737 = vsyncpa [#allocation4], 1 }

</bundles_post_ra>
